<compile_context>
chip_gen: v5e
topology: v5e:2x2
jax: 0.10.0
libtpu: 0.0.40
codegen_flags: <defaults>
</compile_context>

<pallas_src>
import functools

import jax
import jax.numpy as jnp
from jax import lax
from jax.experimental import pallas as pl
from jax.experimental.pallas import tpu as pltpu

KERNEL = 3  # kernel_size=3 in the PyTorch module


def unet_conv_block_kernel(x_ref, w1_ref, b1_ref, w2_ref, b2_ref, o_ref,
                           h1_ref, *, W, HW, HWp):
    """One batch image per grid step; channels on sublanes, spatial on lanes.

    x_ref : (1, Cin, HWp)      VMEM f32   NCHW with spatial flattened and
                                          zero-padded to HWp lanes
    w1_ref: (9, Cmid, Cin)     VMEM bf16  tap-major weights, t = kh*3 + kw
    b1_ref: (Cmid, 1)          VMEM f32
    w2_ref: (9, Cout, Cmid)    VMEM bf16
    b2_ref: (Cout, 1)          VMEM f32
    o_ref : (1, Cout, HW)      VMEM f32   full-grid conv output (valid window
                                          is cropped by the wrapper)
    h1_ref: (Cmid, HWp)        VMEM bf16  scratch: padded conv1 activations
    """
    K = KERNEL
    Cmid = h1_ref.shape[0]

    def conv9(src, w_ref):
        # src: (C, HWp) bf16 slab, lane-dense, zero tail beyond HW.
        # 9 accumulating MXU dots -- no im2col buffer is ever materialized.
        acc = None
        for t in range(K * K):
            kh, kw = divmod(t, K)
            d = kh * W + kw                          # static lane shift
            part = jnp.dot(w_ref[t], src[:, d:d + HW],
                           preferred_element_type=jnp.float32)  # (Cout, HW)
            acc = part if acc is None else acc + part
        return acc                                    # (C_out, HW) f32

    x = x_ref[0].astype(jnp.bfloat16)                 # (Cin, HWp)

    # conv1 + ReLU, stored into the zero-tailed padded scratch so conv2's taps
    # are plain static slices (no in-kernel concatenate).
    h1 = jnp.maximum(conv9(x, w1_ref) + b1_ref[...], 0.0)      # (Cmid, HW) f32
    h1_ref[:, :HW] = h1.astype(jnp.bfloat16)
    h1_ref[:, HW:HWp] = jnp.zeros((Cmid, HWp - HW), jnp.bfloat16)

    # conv2 + ReLU.
    h2 = jnp.maximum(conv9(h1_ref[...], w2_ref) + b2_ref[...], 0.0)
    o_ref[0] = h2.astype(o_ref.dtype)


@jax.jit
def unet_conv_block(x_nchw, w1_oihw, b1, w2_oihw, b2):
    """PyTorch-parity wrapper: x NCHW, weights OIHW (torch Conv2d layout)."""
    N, Cin, H, W = x_nchw.shape
    Cmid = w1_oihw.shape[0]
    Cout = w2_oihw.shape[0]
    K = KERNEL
    HV, WV = H - 2 * (K - 1), W - 2 * (K - 1)   # valid output after two convs
    HW = H * W
    pad_w = (K - 1) * (W + 1)                   # largest tap shift kh*W + kw
    HWp = ((HW + pad_w + 127) // 128) * 128     # lane-aligned padded width

    # Correctness contract of the lane-shift scheme: columns w >= W-(K-1)
    # (row wraparound) and rows h >= H-(K-1) (zero padding) of each
    # intermediate are garbage; composing two such convs is only valid on the
    # (H - 2(K-1), W - 2(K-1)) window cropped below.  Every consumer must go
    # through this wrapper's crop.
    assert HWp >= HW + pad_w, "lane padding must cover the largest tap shift"
    assert w1_oihw.shape[2:] == (K, K) and w2_oihw.shape[2:] == (K, K)

    # Wrapper glue (tiny, overlapped with the kernel via cost_estimate):
    # pre-pad the flattened spatial axis; reorder weights tap-major; cast bf16.
    x_pad = jnp.pad(x_nchw.reshape(N, Cin, HW), ((0, 0), (0, 0), (0, HWp - HW)))
    w1_t = jnp.transpose(w1_oihw, (2, 3, 0, 1)).reshape(K * K, Cmid, Cin)
    w2_t = jnp.transpose(w2_oihw, (2, 3, 0, 1)).reshape(K * K, Cout, Cmid)
    w1_t = w1_t.astype(jnp.bfloat16)
    w2_t = w2_t.astype(jnp.bfloat16)

    kernel = functools.partial(unet_conv_block_kernel, W=W, HW=HW, HWp=HWp)

    flops = 2 * N * HW * K * K * (Cin * Cmid + Cmid * Cout)
    bytes_accessed = (N * Cin * HWp * 4 + K * K * (Cmid * Cin + Cout * Cmid) * 2
                      + (Cmid + Cout) * 4 + N * Cout * HW * 4)
    cost = pl.CostEstimate(flops=flops, transcendentals=0,
                           bytes_accessed=bytes_accessed)

    out_flat = pl.pallas_call(
        kernel,
        out_shape=jax.ShapeDtypeStruct((N, Cout, HW), x_nchw.dtype),
        grid_spec=pltpu.PrefetchScalarGridSpec(
            num_scalar_prefetch=0,
            grid=(N,),
            in_specs=[
                pl.BlockSpec((1, Cin, HWp), lambda n: (n, 0, 0)),
                # Constant blocks: re-fetch is already skipped across steps;
                # at production widths also single-buffer them (Buffered(1)).
                pl.BlockSpec((K * K, Cmid, Cin), lambda n: (0, 0, 0)),
                pl.BlockSpec((Cmid, 1), lambda n: (0, 0)),
                pl.BlockSpec((K * K, Cout, Cmid), lambda n: (0, 0, 0)),
                pl.BlockSpec((Cout, 1), lambda n: (0, 0)),
            ],
            out_specs=pl.BlockSpec((1, Cout, HW), lambda n: (n, 0, 0)),
            scratch_shapes=[pltpu.VMEM((Cmid, HWp), jnp.bfloat16)],
        ),
        compiler_params=pltpu.CompilerParams(
            dimension_semantics=("parallel",)),
        cost_estimate=cost,
    )(x_pad, w1_t, b1.reshape(-1, 1), w2_t, b2.reshape(-1, 1))

    # Lane-dense slab -> crop the valid window (pure reshape + small slice).
    return out_flat.reshape(N, Cout, H, W)[:, :, :HV, :WV]


def _reference(x_nchw, w1, b1, w2, b2):
    """Pure-JAX f32 reference (lax conv) for correctness checking."""
    dn = lax.conv_dimension_numbers(x_nchw.shape, w1.shape,
                                    ("NCHW", "OIHW", "NCHW"))
    h = lax.conv_general_dilated(x_nchw, w1, (1, 1), "VALID",
                                 dimension_numbers=dn)
    h = jnp.maximum(h + b1[None, :, None, None], 0.0)
    o = lax.conv_general_dilated(h, w2, (1, 1), "VALID",
                                 dimension_numbers=dn)
    return jnp.maximum(o + b2[None, :, None, None], 0.0)


if __name__ == "__main__":
    # Module config: in_size=4, out_size=8, kernel_size=3, activation=relu.
    N, Cin, H, W = 2, 4, 16, 16
    Cout = 8

    key = jax.random.PRNGKey(0)
    k_x, k_w1, k_b1, k_w2, k_b2 = jax.random.split(key, 5)

    x = jax.random.normal(k_x, (N, Cin, H, W), dtype=jnp.float32)

    # torch Conv2d-style init: OIHW / (Cout,), uniform(-1/sqrt(fan_in), ...).
    bound1 = 1.0 / (Cin * KERNEL * KERNEL) ** 0.5
    w1 = jax.random.uniform(k_w1, (Cout, Cin, KERNEL, KERNEL),
                            minval=-bound1, maxval=bound1, dtype=jnp.float32)
    b1 = jax.random.uniform(k_b1, (Cout,),
                            minval=-bound1, maxval=bound1, dtype=jnp.float32)
    bound2 = 1.0 / (Cout * KERNEL * KERNEL) ** 0.5
    w2 = jax.random.uniform(k_w2, (Cout, Cout, KERNEL, KERNEL),
                            minval=-bound2, maxval=bound2, dtype=jnp.float32)
    b2 = jax.random.uniform(k_b2, (Cout,),
                            minval=-bound2, maxval=bound2, dtype=jnp.float32)

    out = unet_conv_block(x, w1, b1, w2, b2)
    out = jax.block_until_ready(out)

    ref = _reference(x, w1, b1, w2, b2)
    assert out.shape == (N, Cout, H - 4, W - 4), out.shape
    # bf16 MXU operands (f32 accumulation) -> tolerance loosened vs. pure f32.
    assert jnp.allclose(out, ref, atol=5e-2, rtol=5e-2), \
        float(jnp.max(jnp.abs(out - ref)))

    print("KERNEL_OK")
</pallas_src>

<mosaic_0001>
module attributes {stable_mosaic.version = 11 : i64} {
  func.func @unet_conv_block_kernel(%arg0: i32, %arg1: memref<1x4x384xf32, #tpu.memory_space<vmem>>, %arg2: memref<9x8x4xbf16, #tpu.memory_space<vmem>>, %arg3: memref<8x1xf32, #tpu.memory_space<vmem>>, %arg4: memref<9x8x8xbf16, #tpu.memory_space<vmem>>, %arg5: memref<8x1xf32, #tpu.memory_space<vmem>>, %arg6: memref<1x8x256xf32, #tpu.memory_space<vmem>>, %arg7: memref<8x384xbf16, #tpu.memory_space<vmem>>) attributes {dimension_semantics = [#tpu.dimension_semantics<parallel>], iteration_bounds = array<i64: 2>, scalar_prefetch = 0 : i64, scratch_operands = 1 : i64, tpu.core_type = #tpu.core_type<tc>, window_params = [{transform_indices = @transform_0, window_bounds = array<i64: 1, 4, 384>}, {pipeline_mode = #tpu.pipeline_mode<synchronous>, transform_indices = @transform_1, window_bounds = array<i64: 9, 8, 4>}, {pipeline_mode = #tpu.pipeline_mode<synchronous>, transform_indices = @transform_2, window_bounds = array<i64: 8, 1>}, {pipeline_mode = #tpu.pipeline_mode<synchronous>, transform_indices = @transform_3, window_bounds = array<i64: 9, 8, 8>}, {pipeline_mode = #tpu.pipeline_mode<synchronous>, transform_indices = @transform_4, window_bounds = array<i64: 8, 1>}, {transform_indices = @transform_5, window_bounds = array<i64: 1, 8, 256>}]} {
    %c0 = arith.constant 0 : index
    %c0_0 = arith.constant 0 : index
    %c0_1 = arith.constant 0 : index
    %0 = vector.load %arg1[%c0, %c0_0, %c0_1] : memref<1x4x384xf32, #tpu.memory_space<vmem>>, vector<1x4x384xf32>
    %1 = vector.shape_cast %0 : vector<1x4x384xf32> to vector<4x384xf32>
    %2 = arith.truncf %1 : vector<4x384xf32> to vector<4x384xbf16>
    %c0_2 = arith.constant 0 : index
    %c0_3 = arith.constant 0 : index
    %c0_4 = arith.constant 0 : index
    %3 = vector.load %arg2[%c0_2, %c0_3, %c0_4] : memref<9x8x4xbf16, #tpu.memory_space<vmem>>, vector<1x8x4xbf16>
    %4 = vector.shape_cast %3 : vector<1x8x4xbf16> to vector<8x4xbf16>
    %5 = vector.extract_strided_slice %2 {offsets = [0, 0], sizes = [4, 256], strides = [1, 1]} : vector<4x384xbf16> to vector<4x256xbf16>
    %cst = arith.constant dense<0.000000e+00> : vector<8x256xf32>
    %6 = tpu.matmul %4, %5, %cst {dimension_numbers = #tpu.dot_dimension_numbers<[1], [0], [0], [1], [0, 0, 1, 1], [], []>} : vector<8x4xbf16>, vector<4x256xbf16>, vector<8x256xf32> -> vector<8x256xf32>
    %c1 = arith.constant 1 : index
    %c0_5 = arith.constant 0 : index
    %c0_6 = arith.constant 0 : index
    %7 = vector.load %arg2[%c1, %c0_5, %c0_6] : memref<9x8x4xbf16, #tpu.memory_space<vmem>>, vector<1x8x4xbf16>
    %8 = vector.shape_cast %7 : vector<1x8x4xbf16> to vector<8x4xbf16>
    %9 = vector.extract_strided_slice %2 {offsets = [0, 1], sizes = [4, 256], strides = [1, 1]} : vector<4x384xbf16> to vector<4x256xbf16>
    %cst_7 = arith.constant dense<0.000000e+00> : vector<8x256xf32>
    %10 = tpu.matmul %8, %9, %cst_7 {dimension_numbers = #tpu.dot_dimension_numbers<[1], [0], [0], [1], [0, 0, 1, 1], [], []>} : vector<8x4xbf16>, vector<4x256xbf16>, vector<8x256xf32> -> vector<8x256xf32>
    %11 = arith.addf %6, %10 : vector<8x256xf32>
    %c2 = arith.constant 2 : index
    %c0_8 = arith.constant 0 : index
    %c0_9 = arith.constant 0 : index
    %12 = vector.load %arg2[%c2, %c0_8, %c0_9] : memref<9x8x4xbf16, #tpu.memory_space<vmem>>, vector<1x8x4xbf16>
    %13 = vector.shape_cast %12 : vector<1x8x4xbf16> to vector<8x4xbf16>
    %14 = vector.extract_strided_slice %2 {offsets = [0, 2], sizes = [4, 256], strides = [1, 1]} : vector<4x384xbf16> to vector<4x256xbf16>
    %cst_10 = arith.constant dense<0.000000e+00> : vector<8x256xf32>
    %15 = tpu.matmul %13, %14, %cst_10 {dimension_numbers = #tpu.dot_dimension_numbers<[1], [0], [0], [1], [0, 0, 1, 1], [], []>} : vector<8x4xbf16>, vector<4x256xbf16>, vector<8x256xf32> -> vector<8x256xf32>
    %16 = arith.addf %11, %15 : vector<8x256xf32>
    %c3 = arith.constant 3 : index
    %c0_11 = arith.constant 0 : index
    %c0_12 = arith.constant 0 : index
    %17 = vector.load %arg2[%c3, %c0_11, %c0_12] : memref<9x8x4xbf16, #tpu.memory_space<vmem>>, vector<1x8x4xbf16>
    %18 = vector.shape_cast %17 : vector<1x8x4xbf16> to vector<8x4xbf16>
    %19 = vector.extract_strided_slice %2 {offsets = [0, 16], sizes = [4, 256], strides = [1, 1]} : vector<4x384xbf16> to vector<4x256xbf16>
    %cst_13 = arith.constant dense<0.000000e+00> : vector<8x256xf32>
    %20 = tpu.matmul %18, %19, %cst_13 {dimension_numbers = #tpu.dot_dimension_numbers<[1], [0], [0], [1], [0, 0, 1, 1], [], []>} : vector<8x4xbf16>, vector<4x256xbf16>, vector<8x256xf32> -> vector<8x256xf32>
    %21 = arith.addf %16, %20 : vector<8x256xf32>
    %c4 = arith.constant 4 : index
    %c0_14 = arith.constant 0 : index
    %c0_15 = arith.constant 0 : index
    %22 = vector.load %arg2[%c4, %c0_14, %c0_15] : memref<9x8x4xbf16, #tpu.memory_space<vmem>>, vector<1x8x4xbf16>
    %23 = vector.shape_cast %22 : vector<1x8x4xbf16> to vector<8x4xbf16>
    %24 = vector.extract_strided_slice %2 {offsets = [0, 17], sizes = [4, 256], strides = [1, 1]} : vector<4x384xbf16> to vector<4x256xbf16>
    %cst_16 = arith.constant dense<0.000000e+00> : vector<8x256xf32>
    %25 = tpu.matmul %23, %24, %cst_16 {dimension_numbers = #tpu.dot_dimension_numbers<[1], [0], [0], [1], [0, 0, 1, 1], [], []>} : vector<8x4xbf16>, vector<4x256xbf16>, vector<8x256xf32> -> vector<8x256xf32>
    %26 = arith.addf %21, %25 : vector<8x256xf32>
    %c5 = arith.constant 5 : index
    %c0_17 = arith.constant 0 : index
    %c0_18 = arith.constant 0 : index
    %27 = vector.load %arg2[%c5, %c0_17, %c0_18] : memref<9x8x4xbf16, #tpu.memory_space<vmem>>, vector<1x8x4xbf16>
    %28 = vector.shape_cast %27 : vector<1x8x4xbf16> to vector<8x4xbf16>
    %29 = vector.extract_strided_slice %2 {offsets = [0, 18], sizes = [4, 256], strides = [1, 1]} : vector<4x384xbf16> to vector<4x256xbf16>
    %cst_19 = arith.constant dense<0.000000e+00> : vector<8x256xf32>
    %30 = tpu.matmul %28, %29, %cst_19 {dimension_numbers = #tpu.dot_dimension_numbers<[1], [0], [0], [1], [0, 0, 1, 1], [], []>} : vector<8x4xbf16>, vector<4x256xbf16>, vector<8x256xf32> -> vector<8x256xf32>
    %31 = arith.addf %26, %30 : vector<8x256xf32>
    %c6 = arith.constant 6 : index
    %c0_20 = arith.constant 0 : index
    %c0_21 = arith.constant 0 : index
    %32 = vector.load %arg2[%c6, %c0_20, %c0_21] : memref<9x8x4xbf16, #tpu.memory_space<vmem>>, vector<1x8x4xbf16>
    %33 = vector.shape_cast %32 : vector<1x8x4xbf16> to vector<8x4xbf16>
    %34 = vector.extract_strided_slice %2 {offsets = [0, 32], sizes = [4, 256], strides = [1, 1]} : vector<4x384xbf16> to vector<4x256xbf16>
    %cst_22 = arith.constant dense<0.000000e+00> : vector<8x256xf32>
    %35 = tpu.matmul %33, %34, %cst_22 {dimension_numbers = #tpu.dot_dimension_numbers<[1], [0], [0], [1], [0, 0, 1, 1], [], []>} : vector<8x4xbf16>, vector<4x256xbf16>, vector<8x256xf32> -> vector<8x256xf32>
    %36 = arith.addf %31, %35 : vector<8x256xf32>
    %c7 = arith.constant 7 : index
    %c0_23 = arith.constant 0 : index
    %c0_24 = arith.constant 0 : index
    %37 = vector.load %arg2[%c7, %c0_23, %c0_24] : memref<9x8x4xbf16, #tpu.memory_space<vmem>>, vector<1x8x4xbf16>
    %38 = vector.shape_cast %37 : vector<1x8x4xbf16> to vector<8x4xbf16>
    %39 = vector.extract_strided_slice %2 {offsets = [0, 33], sizes = [4, 256], strides = [1, 1]} : vector<4x384xbf16> to vector<4x256xbf16>
    %cst_25 = arith.constant dense<0.000000e+00> : vector<8x256xf32>
    %40 = tpu.matmul %38, %39, %cst_25 {dimension_numbers = #tpu.dot_dimension_numbers<[1], [0], [0], [1], [0, 0, 1, 1], [], []>} : vector<8x4xbf16>, vector<4x256xbf16>, vector<8x256xf32> -> vector<8x256xf32>
    %41 = arith.addf %36, %40 : vector<8x256xf32>
    %c8 = arith.constant 8 : index
    %c0_26 = arith.constant 0 : index
    %c0_27 = arith.constant 0 : index
    %42 = vector.load %arg2[%c8, %c0_26, %c0_27] : memref<9x8x4xbf16, #tpu.memory_space<vmem>>, vector<1x8x4xbf16>
    %43 = vector.shape_cast %42 : vector<1x8x4xbf16> to vector<8x4xbf16>
    %44 = vector.extract_strided_slice %2 {offsets = [0, 34], sizes = [4, 256], strides = [1, 1]} : vector<4x384xbf16> to vector<4x256xbf16>
    %cst_28 = arith.constant dense<0.000000e+00> : vector<8x256xf32>
    %45 = tpu.matmul %43, %44, %cst_28 {dimension_numbers = #tpu.dot_dimension_numbers<[1], [0], [0], [1], [0, 0, 1, 1], [], []>} : vector<8x4xbf16>, vector<4x256xbf16>, vector<8x256xf32> -> vector<8x256xf32>
    %46 = arith.addf %41, %45 : vector<8x256xf32>
    %c0_29 = arith.constant 0 : index
    %c0_30 = arith.constant 0 : index
    %47 = vector.load %arg3[%c0_29, %c0_30] : memref<8x1xf32, #tpu.memory_space<vmem>>, vector<8x1xf32>
    %48 = vector.broadcast %47 : vector<8x1xf32> to vector<8x256xf32>
    %49 = arith.addf %46, %48 : vector<8x256xf32>
    %cst_31 = arith.constant 0.000000e+00 : f32
    %50 = vector.broadcast %cst_31 : f32 to vector<8x256xf32>
    %51 = arith.maximumf %49, %50 : vector<8x256xf32>
    %52 = arith.truncf %51 : vector<8x256xf32> to vector<8x256xbf16>
    %c0_32 = arith.constant 0 : index
    %c0_33 = arith.constant 0 : index
    %53 = vector.load %arg7[%c0_32, %c0_33] : memref<8x384xbf16, #tpu.memory_space<vmem>>, vector<8x256xbf16>
    tpu.vector_store %arg7[%c0_32, %c0_33], %52 {strides = array<i32>} : memref<8x384xbf16, #tpu.memory_space<vmem>>, vector<8x256xbf16>,
    %cst_34 = arith.constant 0.000000e+00 : bf16
    %54 = vector.broadcast %cst_34 : bf16 to vector<8x128xbf16>
    %c0_35 = arith.constant 0 : index
    %c256 = arith.constant 256 : index
    %55 = vector.load %arg7[%c0_35, %c256] : memref<8x384xbf16, #tpu.memory_space<vmem>>, vector<8x128xbf16>
    tpu.vector_store %arg7[%c0_35, %c256], %54 {strides = array<i32>} : memref<8x384xbf16, #tpu.memory_space<vmem>>, vector<8x128xbf16>,
    %c0_36 = arith.constant 0 : index
    %c0_37 = arith.constant 0 : index
    %56 = vector.load %arg7[%c0_36, %c0_37] : memref<8x384xbf16, #tpu.memory_space<vmem>>, vector<8x384xbf16>
    %c0_38 = arith.constant 0 : index
    %c0_39 = arith.constant 0 : index
    %c0_40 = arith.constant 0 : index
    %57 = vector.load %arg4[%c0_38, %c0_39, %c0_40] : memref<9x8x8xbf16, #tpu.memory_space<vmem>>, vector<1x8x8xbf16>
    %58 = vector.shape_cast %57 : vector<1x8x8xbf16> to vector<8x8xbf16>
    %59 = vector.extract_strided_slice %56 {offsets = [0, 0], sizes = [8, 256], strides = [1, 1]} : vector<8x384xbf16> to vector<8x256xbf16>
    %cst_41 = arith.constant dense<0.000000e+00> : vector<8x256xf32>
    %60 = tpu.matmul %58, %59, %cst_41 {dimension_numbers = #tpu.dot_dimension_numbers<[1], [0], [0], [1], [0, 0, 1, 1], [], []>} : vector<8x8xbf16>, vector<8x256xbf16>, vector<8x256xf32> -> vector<8x256xf32>
    %c1_42 = arith.constant 1 : index
    %c0_43 = arith.constant 0 : index
    %c0_44 = arith.constant 0 : index
    %61 = vector.load %arg4[%c1_42, %c0_43, %c0_44] : memref<9x8x8xbf16, #tpu.memory_space<vmem>>, vector<1x8x8xbf16>
    %62 = vector.shape_cast %61 : vector<1x8x8xbf16> to vector<8x8xbf16>
    %63 = vector.extract_strided_slice %56 {offsets = [0, 1], sizes = [8, 256], strides = [1, 1]} : vector<8x384xbf16> to vector<8x256xbf16>
    %cst_45 = arith.constant dense<0.000000e+00> : vector<8x256xf32>
    %64 = tpu.matmul %62, %63, %cst_45 {dimension_numbers = #tpu.dot_dimension_numbers<[1], [0], [0], [1], [0, 0, 1, 1], [], []>} : vector<8x8xbf16>, vector<8x256xbf16>, vector<8x256xf32> -> vector<8x256xf32>
    %65 = arith.addf %60, %64 : vector<8x256xf32>
    %c2_46 = arith.constant 2 : index
    %c0_47 = arith.constant 0 : index
    %c0_48 = arith.constant 0 : index
    %66 = vector.load %arg4[%c2_46, %c0_47, %c0_48] : memref<9x8x8xbf16, #tpu.memory_space<vmem>>, vector<1x8x8xbf16>
    %67 = vector.shape_cast %66 : vector<1x8x8xbf16> to vector<8x8xbf16>
    %68 = vector.extract_strided_slice %56 {offsets = [0, 2], sizes = [8, 256], strides = [1, 1]} : vector<8x384xbf16> to vector<8x256xbf16>
    %cst_49 = arith.constant dense<0.000000e+00> : vector<8x256xf32>
    %69 = tpu.matmul %67, %68, %cst_49 {dimension_numbers = #tpu.dot_dimension_numbers<[1], [0], [0], [1], [0, 0, 1, 1], [], []>} : vector<8x8xbf16>, vector<8x256xbf16>, vector<8x256xf32> -> vector<8x256xf32>
    %70 = arith.addf %65, %69 : vector<8x256xf32>
    %c3_50 = arith.constant 3 : index
    %c0_51 = arith.constant 0 : index
    %c0_52 = arith.constant 0 : index
    %71 = vector.load %arg4[%c3_50, %c0_51, %c0_52] : memref<9x8x8xbf16, #tpu.memory_space<vmem>>, vector<1x8x8xbf16>
    %72 = vector.shape_cast %71 : vector<1x8x8xbf16> to vector<8x8xbf16>
    %73 = vector.extract_strided_slice %56 {offsets = [0, 16], sizes = [8, 256], strides = [1, 1]} : vector<8x384xbf16> to vector<8x256xbf16>
    %cst_53 = arith.constant dense<0.000000e+00> : vector<8x256xf32>
    %74 = tpu.matmul %72, %73, %cst_53 {dimension_numbers = #tpu.dot_dimension_numbers<[1], [0], [0], [1], [0, 0, 1, 1], [], []>} : vector<8x8xbf16>, vector<8x256xbf16>, vector<8x256xf32> -> vector<8x256xf32>
    %75 = arith.addf %70, %74 : vector<8x256xf32>
    %c4_54 = arith.constant 4 : index
    %c0_55 = arith.constant 0 : index
    %c0_56 = arith.constant 0 : index
    %76 = vector.load %arg4[%c4_54, %c0_55, %c0_56] : memref<9x8x8xbf16, #tpu.memory_space<vmem>>, vector<1x8x8xbf16>
    %77 = vector.shape_cast %76 : vector<1x8x8xbf16> to vector<8x8xbf16>
    %78 = vector.extract_strided_slice %56 {offsets = [0, 17], sizes = [8, 256], strides = [1, 1]} : vector<8x384xbf16> to vector<8x256xbf16>
    %cst_57 = arith.constant dense<0.000000e+00> : vector<8x256xf32>
    %79 = tpu.matmul %77, %78, %cst_57 {dimension_numbers = #tpu.dot_dimension_numbers<[1], [0], [0], [1], [0, 0, 1, 1], [], []>} : vector<8x8xbf16>, vector<8x256xbf16>, vector<8x256xf32> -> vector<8x256xf32>
    %80 = arith.addf %75, %79 : vector<8x256xf32>
    %c5_58 = arith.constant 5 : index
    %c0_59 = arith.constant 0 : index
    %c0_60 = arith.constant 0 : index
    %81 = vector.load %arg4[%c5_58, %c0_59, %c0_60] : memref<9x8x8xbf16, #tpu.memory_space<vmem>>, vector<1x8x8xbf16>
    %82 = vector.shape_cast %81 : vector<1x8x8xbf16> to vector<8x8xbf16>
    %83 = vector.extract_strided_slice %56 {offsets = [0, 18], sizes = [8, 256], strides = [1, 1]} : vector<8x384xbf16> to vector<8x256xbf16>
    %cst_61 = arith.constant dense<0.000000e+00> : vector<8x256xf32>
    %84 = tpu.matmul %82, %83, %cst_61 {dimension_numbers = #tpu.dot_dimension_numbers<[1], [0], [0], [1], [0, 0, 1, 1], [], []>} : vector<8x8xbf16>, vector<8x256xbf16>, vector<8x256xf32> -> vector<8x256xf32>
    %85 = arith.addf %80, %84 : vector<8x256xf32>
    %c6_62 = arith.constant 6 : index
    %c0_63 = arith.constant 0 : index
    %c0_64 = arith.constant 0 : index
    %86 = vector.load %arg4[%c6_62, %c0_63, %c0_64] : memref<9x8x8xbf16, #tpu.memory_space<vmem>>, vector<1x8x8xbf16>
    %87 = vector.shape_cast %86 : vector<1x8x8xbf16> to vector<8x8xbf16>
    %88 = vector.extract_strided_slice %56 {offsets = [0, 32], sizes = [8, 256], strides = [1, 1]} : vector<8x384xbf16> to vector<8x256xbf16>
    %cst_65 = arith.constant dense<0.000000e+00> : vector<8x256xf32>
    %89 = tpu.matmul %87, %88, %cst_65 {dimension_numbers = #tpu.dot_dimension_numbers<[1], [0], [0], [1], [0, 0, 1, 1], [], []>} : vector<8x8xbf16>, vector<8x256xbf16>, vector<8x256xf32> -> vector<8x256xf32>
    %90 = arith.addf %85, %89 : vector<8x256xf32>
    %c7_66 = arith.constant 7 : index
    %c0_67 = arith.constant 0 : index
    %c0_68 = arith.constant 0 : index
    %91 = vector.load %arg4[%c7_66, %c0_67, %c0_68] : memref<9x8x8xbf16, #tpu.memory_space<vmem>>, vector<1x8x8xbf16>
    %92 = vector.shape_cast %91 : vector<1x8x8xbf16> to vector<8x8xbf16>
    %93 = vector.extract_strided_slice %56 {offsets = [0, 33], sizes = [8, 256], strides = [1, 1]} : vector<8x384xbf16> to vector<8x256xbf16>
    %cst_69 = arith.constant dense<0.000000e+00> : vector<8x256xf32>
    %94 = tpu.matmul %92, %93, %cst_69 {dimension_numbers = #tpu.dot_dimension_numbers<[1], [0], [0], [1], [0, 0, 1, 1], [], []>} : vector<8x8xbf16>, vector<8x256xbf16>, vector<8x256xf32> -> vector<8x256xf32>
    %95 = arith.addf %90, %94 : vector<8x256xf32>
    %c8_70 = arith.constant 8 : index
    %c0_71 = arith.constant 0 : index
    %c0_72 = arith.constant 0 : index
    %96 = vector.load %arg4[%c8_70, %c0_71, %c0_72] : memref<9x8x8xbf16, #tpu.memory_space<vmem>>, vector<1x8x8xbf16>
    %97 = vector.shape_cast %96 : vector<1x8x8xbf16> to vector<8x8xbf16>
    %98 = vector.extract_strided_slice %56 {offsets = [0, 34], sizes = [8, 256], strides = [1, 1]} : vector<8x384xbf16> to vector<8x256xbf16>
    %cst_73 = arith.constant dense<0.000000e+00> : vector<8x256xf32>
    %99 = tpu.matmul %97, %98, %cst_73 {dimension_numbers = #tpu.dot_dimension_numbers<[1], [0], [0], [1], [0, 0, 1, 1], [], []>} : vector<8x8xbf16>, vector<8x256xbf16>, vector<8x256xf32> -> vector<8x256xf32>
    %100 = arith.addf %95, %99 : vector<8x256xf32>
    %c0_74 = arith.constant 0 : index
    %c0_75 = arith.constant 0 : index
    %101 = vector.load %arg5[%c0_74, %c0_75] : memref<8x1xf32, #tpu.memory_space<vmem>>, vector<8x1xf32>
    %102 = vector.broadcast %101 : vector<8x1xf32> to vector<8x256xf32>
    %103 = arith.addf %100, %102 : vector<8x256xf32>
    %cst_76 = arith.constant 0.000000e+00 : f32
    %104 = vector.broadcast %cst_76 : f32 to vector<8x256xf32>
    %105 = arith.maximumf %103, %104 : vector<8x256xf32>
    %c0_77 = arith.constant 0 : index
    %c0_78 = arith.constant 0 : index
    %c0_79 = arith.constant 0 : index
    %106 = vector.load %arg6[%c0_77, %c0_78, %c0_79] : memref<1x8x256xf32, #tpu.memory_space<vmem>>, vector<1x8x256xf32>
    %107 = vector.shape_cast %106 : vector<1x8x256xf32> to vector<8x256xf32>
    %108 = vector.shape_cast %105 : vector<8x256xf32> to vector<1x8x256xf32>
    tpu.vector_store %arg6[%c0_77, %c0_78, %c0_79], %108 {strides = array<i32>} : memref<1x8x256xf32, #tpu.memory_space<vmem>>, vector<1x8x256xf32>,
    return
  }
  func.func @transform_0(%arg0: i32) -> (i32, i32, i32) {
    %c0_i32 = arith.constant 0 : i32
    %c0_i32_0 = arith.constant 0 : i32
    %c0_i32_1 = arith.constant 0 : i32
    return %arg0, %c0_i32, %c0_i32_0 : i32, i32, i32
  }
  func.func @transform_1(%arg0: i32) -> (i32, i32, i32) {
    %c0_i32 = arith.constant 0 : i32
    %c0_i32_0 = arith.constant 0 : i32
    %c0_i32_1 = arith.constant 0 : i32
    %c0_i32_2 = arith.constant 0 : i32
    return %c0_i32, %c0_i32_0, %c0_i32_1 : i32, i32, i32
  }
  func.func @transform_2(%arg0: i32) -> (i32, i32) {
    %c0_i32 = arith.constant 0 : i32
    %c0_i32_0 = arith.constant 0 : i32
    %c0_i32_1 = arith.constant 0 : i32
    return %c0_i32, %c0_i32_0 : i32, i32
  }
  func.func @transform_3(%arg0: i32) -> (i32, i32, i32) {
    %c0_i32 = arith.constant 0 : i32
    %c0_i32_0 = arith.constant 0 : i32
    %c0_i32_1 = arith.constant 0 : i32
    %c0_i32_2 = arith.constant 0 : i32
    return %c0_i32, %c0_i32_0, %c0_i32_1 : i32, i32, i32
  }
  func.func @transform_4(%arg0: i32) -> (i32, i32) {
    %c0_i32 = arith.constant 0 : i32
    %c0_i32_0 = arith.constant 0 : i32
    %c0_i32_1 = arith.constant 0 : i32
    return %c0_i32, %c0_i32_0 : i32, i32
  }
  func.func @transform_5(%arg0: i32) -> (i32, i32, i32) {
    %c0_i32 = arith.constant 0 : i32
    %c0_i32_0 = arith.constant 0 : i32
    %c0_i32_1 = arith.constant 0 : i32
    return %arg0, %c0_i32, %c0_i32_0 : i32, i32, i32
  }
}

</mosaic_0001>

<bundles_post_ra>
// kernel: unet_conv_block.1
= control target key start
LH: loop header
LB: loop body
LE: loop exit
PB: predicated region body
PF: predicated region fallthrough
CT: control target
= control target key end

     0   :  { %s1301_s18 = smov 0   ;;  %s1534_s0 = inlined_call_operand.vmem [shape: f32[2,4,384], index: 0, kind: input, shape index: {}]   ;;  %s1535_s1 = inlined_call_operand.vmem [shape: bf16[9,8,4], index: 1, kind: input, shape index: {}]   ;;  %s1536_s2 = inlined_call_operand.vmem [shape: f32[8,1], index: 2, kind: input, shape index: {}]   ;;  %s1537_s3 = inlined_call_operand.vmem [shape: bf16[9,8,8], index: 3, kind: input, shape index: {}]   ;;  %s1538_s4 = inlined_call_operand.vmem [shape: f32[8,1], index: 4, kind: input, shape index: {}]   ;;  %s1539_s5 = inlined_call_operand.vmem [shape: f32[2,8,256], index: 5, kind: output, shape index: {}]  }
   0x1 LB: > { %s1171_s19 = sadd.s32 4294967295, %s1260_s18   ;;  %p1175_p0 = scmp.ge.s32.totalorder %s1260_s18, 1  ;;  %s1260_s18 = sphi %s1301_s18, %s15_s18  }
   0x2   : > { %p187_p1 = scmp.lt.s32.totalorder %s1260_s18, 3 }
   0x4   : > { %p188_p2 = pnand %p1175_p0, %p187_p1 }
   0x5   : > { %p215_p3 = scmp.lt.s32.totalorder (!%p188_p2), %s1171_s19, 1  ;;  %s1262_s24 = smov (!%p188_p2), 127  }
   0x6   : > { %191 = sbr.rel (%p188_p2) target bundleno = 693 (0x2b5), region = 40  ;;  %s1263_s25 = smov (!%p188_p2), 126  }
   0x7   : > { %s1264_s26 = smov (!%p188_p2), 112   ;;  %s1265_s27 = smov (!%p188_p2), 111  }
   0x8   : > { %s1266_s28 = smov (!%p188_p2), 110   ;;  %s1267_s29 = smov (!%p188_p2), 96  }
   0x9   : > { %s1268_s30 = smov (!%p188_p2), 95   ;;  %s1269_s6 = smov (!%p188_p2), 94  }
   0xb   : > { %s1541_s19 = smov (!%p215_p3, %s1171_s19), 1  ;;  %vm265_vm0 = vcmask 1041408   ;;  %v241_v15 = vld [vmem:[%s1535_s1] sm:$0xf]  ;;  %vm261_vm1 = vcmask 31744   ;;  %vm341_vm2 = vcmask 1031168  }
   0xc   : > { %s1234_s20 = smul.u32 12, %s1541_s19  ;;  %vm258_vm3 = vcmask 1039360   ;;  %v1179_v30 = vld [vmem:[%s1535_s1 + $0x4] sm:$0xf]  ;;  %vm389_vm4 = vcmask 916480   ;;  %vm437_vm5 = vcmask 908288  }
   0xd   : > { %v1187_v39 = vld [vmem:[%s1535_s1 + $0xc] sm:$0xf]  ;;  %v1184_v46 = vld [vmem:[%s1535_s1 + $0x8] sm:$0xf]  ;;  %vm485_vm6 = vcmask 900096   ;;  %vm533_vm7 = vcmask 785408  }
   0xe   : > { %s219_s23 = scalar_lea.vmem %s1534_s0, %s1234_s20  ;;  %v1193_v54 = vld [vmem:[%s1535_s1 + $0x14] sm:$0xf]  ;;  %v1190_v62 = vld [vmem:[%s1535_s1 + $0x10] sm:$0xf]  ;;  %v669_v63 = vld [vmem:[%s1536_s2] sm:$0xff]  ;;  %vm581_vm8 = vcmask 777216  }
   0xf   : > { %v226_v0 = vld [vmem:[%s219_s23] sm:$0xff]  ;;  %v227_v1 = vld [vmem:[%s219_s23 + $0x8] sm:$0xf]  ;;  %vm629_vm9 = vcmask 769024   ;;  %vm707_vm10 = vcmask 1043456   ;;  %vm703_vm11 = vcmask 64512  }
  0x10   : > { %230 = vst [vmem:[#allocation1] ss:$2 sm:$0xff] %v226_v0  ;;  %s1233_s9 = sshll.u32 %s1541_s19, 4 }
  0x11   : > { %232 = vst [vmem:[#allocation1 + $0x10] ss:$2 sm:$0xff] %v227_v1  ;;  %v1270_v1 = vmov 0  }
  0x12   : > { %1252 = vset.pattern.permute.xlu0 %v1270_v1  ;;  %681 = vst [vmem:[#allocation2 + $0x8] sm:$0xf] %v1270_v1  ;;  %1253 = vset.pattern.permute.xlu2 %v1270_v1 }
  0x17   : > { %v233_v2 = vld.sshfl [vmem:[#allocation1] sm:$0xff pattern:$0x75316420]  ;;  %v234_v3 = vld.sshfl [vmem:[#allocation1 + $0x8] sm:$0xff pattern:$0x75316420] }
  0x18   : > { %v239_v4 = vpack.c.bf16 %v234_v3, %v233_v2  ;;  %v235_v5 = vld.sshfl [vmem:[#allocation1 + $0x10] sm:$0xff pattern:$0x75316420] }
  0x19   : > { %v240_v6 = vpack.c.bf16 %v235_v5, %v235_v5 }
  0x1a   : > { %v246_v7 = vunpack.c.l.b16 %v239_v4  ;;  %v247_v8 = vunpack.c.h.b16 %v239_v4 }
  0x1b   : > { %v248_v9 = vunpack.c.l.b16 %v240_v6 }
  0x1c   : > { %v249_v10 = vpack.c.b16 %v246_v7, %v246_v7  ;;  %v250_v11 = vpack.c.b16 %v247_v8, %v247_v8  ;;  %v1199_v8 = vld [vmem:[%s1535_s1 + $0x1c] sm:$0xf] }
  0x1d   : > { %v251_v12 = vpack.c.b16 %v248_v9, %v248_v9 }
  0x1e   : > { %252 = vrot.lane.b32.xlu0 %v249_v10, %s1262_s24  ;;  %337 = vrot.lane.b32.xlu2 %v250_v11, %s1263_s25  ;;  %v302_v13 = vsel %vm265_vm0, %v249_v10, 0  ;;  %v305_v14 = vsel %vm265_vm0, %v250_v11, 0 }
  0x1f   : > { %256 = vrot.lane.b32.xlu1 %v251_v12, %s1262_s24  ;;  %314 = vmatpush.bf16.msra.mxu2 %v302_v13 }
  0x20   : > { %327 = vmatpush.bf16.msra.mxu3 %v305_v14  ;;  %v1196_v14 = vld [vmem:[%s1535_s1 + $0x18] sm:$0xf] }
  0x22   : > { %1182 = vmatmul.msk.bf16.vlgmr.msra.gmra.mxu2 %vm261_vm1, %v241_v15 }
  0x23   : > { %1183 = vmatmul.msk.bf16.vlgmr.msra.gmra.mxu3 %vm261_vm1, %v241_v15 }
  0x26   : > { %254 = vrot.lane.b32.xlu0 %v250_v11, %s1262_s24  ;;  %339 = vrot.lane.b32.xlu2 %v251_v12, %s1263_s25 }
  0x27   : > { %335 = vrot.lane.b32.xlu1 %v249_v10, %s1263_s25 }
  0x2e   : > { %383 = vrot.lane.b32.xlu0 %v249_v10, %s1264_s26  ;;  %387 = vrot.lane.b32.xlu2 %v251_v12, %s1264_s26 }
  0x2f   : > { %385 = vrot.lane.b32.xlu1 %v250_v11, %s1264_s26 }
  0x36   : > { %431 = vrot.lane.b32.xlu0 %v249_v10, %s1265_s27  ;;  %435 = vrot.lane.b32.xlu2 %v251_v12, %s1265_s27 }
  0x37   : > { %433 = vrot.lane.b32.xlu1 %v250_v11, %s1265_s27 }
  0x3e   : > { %479 = vrot.lane.b32.xlu0 %v249_v10, %s1266_s28  ;;  %483 = vrot.lane.b32.xlu2 %v251_v12, %s1266_s28 }
  0x3f   : > { %481 = vrot.lane.b32.xlu1 %v250_v11, %s1266_s28 }
  0x46   : > { %527 = vrot.lane.b32.xlu0 %v249_v10, %s1267_s29  ;;  %531 = vrot.lane.b32.xlu2 %v251_v12, %s1267_s29 }
  0x47   : > { %529 = vrot.lane.b32.xlu1 %v250_v11, %s1267_s29 }
  0x4e   : > { %575 = vrot.lane.b32.xlu0 %v249_v10, %s1268_s30  ;;  %579 = vrot.lane.b32.xlu2 %v251_v12, %s1268_s30 }
  0x4f   : > { %577 = vrot.lane.b32.xlu1 %v250_v11, %s1268_s30 }
  0x56   : > { %623 = vrot.lane.b32.xlu0 %v249_v10, %s1269_s6  ;;  %627 = vrot.lane.b32.xlu2 %v251_v12, %s1269_s6 }
  0x57   : > { %625 = vrot.lane.b32.xlu1 %v250_v11, %s1269_s6 }
  0x5e   : > { %672 = vperm.xlu0 %1252, %v669_v63  }
  0x78   : > { %v338_v16 = vpop.permute.xlu2 %337 }
  0x80   : > { %v340_v17 = vpop.permute.xlu2 %339 }
  0x81   : > { %v343_v20 = vsel %vm341_vm2, %v338_v16, %v340_v17  ;;  %v1202_v17 = vld [vmem:[%s1535_s1 + $0x20] sm:$0xf] }
  0x82   : > { %v351_v26 = vsel %vm265_vm0, %v343_v20, 0 }
  0x88   : > { %v388_v21 = vpop.permute.xlu2 %387 }
  0x90   : > { %v253_v18 = vpop.permute.xlu0 %252  ;;  %v436_v34 = vpop.permute.xlu2 %435 }
  0x91   : > { %v257_v19 = vpop.permute.xlu1 %256 }
  0x98   : > { %v255_v22 = vpop.permute.xlu0 %254  ;;  %v484_v47 = vpop.permute.xlu2 %483 }
  0x99   : > { %v259_v23 = vsel %vm258_vm3, %v253_v18, %v255_v22  ;;  %v260_v24 = vsel %vm258_vm3, %v255_v22, %v257_v19  ;;  %v336_v25 = vpop.permute.xlu1 %335 }
  0x9a   : > { %v267_v27 = vsel %vm265_vm0, %v259_v23, 0  ;;  %v270_v28 = vsel %vm265_vm0, %v260_v24, 0  ;;  %v342_v29 = vsel %vm341_vm2, %v336_v25, %v338_v16 }
  0x9b   : > { %279 = vmatpush.bf16.msra.mxu0 %v267_v27  ;;  %292 = vmatpush.bf16.msra.mxu1 %v270_v28  ;;  %v348_v31 = vsel %vm265_vm0, %v342_v29, 0 }
  0x9e   : > { %1180 = vmatmul.msk.bf16.vlgmr.msra.gmra.mxu0 %vm261_vm1, %v1179_v30  ;;  %1181 = vmatmul.msk.bf16.vlgmr.msra.gmra.mxu1 %vm261_vm1, %v1179_v30 }
  0x9f   : > { %360 = vmatpush.bf16.msrb.mxu0 %v348_v31  ;;  %373 = vmatpush.bf16.msrb.mxu1 %v351_v26 }
  0xa0   : > { %v384_v32 = vpop.permute.xlu0 %383  ;;  %v532_v55 = vpop.permute.xlu2 %531 }
  0xa1   : > { %v386_v33 = vpop.permute.xlu1 %385 }
  0xa2   : > { %v390_v35 = vsel %vm389_vm4, %v384_v32, %v386_v33  ;;  %v391_v36 = vsel %vm389_vm4, %v386_v33, %v388_v21 }
  0xa3   : > { %v396_v37 = vsel %vm265_vm0, %v390_v35, 0  ;;  %v399_v38 = vsel %vm265_vm0, %v391_v36, 0 }
  0xa4   : > { %408 = vmatpush.bf16.msrb.mxu2 %v396_v37  ;;  %421 = vmatpush.bf16.msrb.mxu3 %v399_v38 }
  0xa5   : > { %v316_v18 = vpop.f32.mrf.mxu2 }
  0xa6   : > { %v329_v19 = vpop.f32.mrf.mxu3 }
  0xa7   : > { %1188 = vmatmul.msk.bf16.vlgmr.msrb.gmra.mxu2 %vm261_vm1, %v1187_v39  ;;  %1189 = vmatmul.msk.bf16.vlgmr.msrb.gmra.mxu3 %vm261_vm1, %v1187_v39 }
  0xa8   : > { %v432_v40 = vpop.permute.xlu0 %431  ;;  %v580_v0 = vpop.permute.xlu2 %579 }
  0xa9   : > { %v434_v41 = vpop.permute.xlu1 %433 }
  0xaa   : > { %v439_v42 = vsel %vm437_vm5, %v434_v41, %v436_v34  ;;  %v438_v43 = vsel %vm437_vm5, %v432_v40, %v434_v41 }
  0xab   : > { %v447_v44 = vsel %vm265_vm0, %v439_v42, 0  ;;  %v444_v45 = vsel %vm265_vm0, %v438_v43, 0 }
  0xac   : > { %456 = vmatpush.bf16.msra.mxu0 %v444_v45  ;;  %469 = vmatpush.bf16.msra.mxu1 %v447_v44 }
  0xad   : > { %v318_v20 = vpop.f32.mrf.mxu2 }
  0xae   : > { %1185 = vmatmul.msk.bf16.vlgmr.msrb.gmra.mxu0 %vm261_vm1, %v1184_v46  ;;  %1186 = vmatmul.msk.bf16.vlgmr.msrb.gmra.mxu1 %vm261_vm1, %v1184_v46  ;;  %v331_v21 = vpop.f32.mrf.mxu3 }
  0xb0   : > { %v480_v48 = vpop.permute.xlu0 %479  ;;  %v628_v9 = vpop.permute.xlu2 %627 }
  0xb1   : > { %v482_v49 = vpop.permute.xlu1 %481 }
  0xb2   : > { %v487_v50 = vsel %vm485_vm6, %v482_v49, %v484_v47  ;;  %v486_v51 = vsel %vm485_vm6, %v480_v48, %v482_v49 }
  0xb3   : > { %v495_v52 = vsel %vm265_vm0, %v487_v50, 0  ;;  %v492_v53 = vsel %vm265_vm0, %v486_v51, 0 }
  0xb4   : > { %504 = vmatpush.bf16.msra.mxu2 %v492_v53  ;;  %517 = vmatpush.bf16.msra.mxu3 %v495_v52 }
  0xb7   : > { %1194 = vmatmul.msk.bf16.vlgmr.msra.gmra.mxu2 %vm261_vm1, %v1193_v54  ;;  %1195 = vmatmul.msk.bf16.vlgmr.msra.gmra.mxu3 %vm261_vm1, %v1193_v54 }
  0xb8   : > { %v528_v56 = vpop.permute.xlu0 %527 }
  0xb9   : > { %v530_v57 = vpop.permute.xlu1 %529 }
  0xba   : > { %v535_v58 = vsel %vm533_vm7, %v530_v57, %v532_v55  ;;  %v534_v59 = vsel %vm533_vm7, %v528_v56, %v530_v57 }
  0xbb   : > { %v543_v60 = vsel %vm265_vm0, %v535_v58, 0  ;;  %v540_v61 = vsel %vm265_vm0, %v534_v59, 0 }
  0xbc   : > { %552 = vmatpush.bf16.msrb.mxu0 %v540_v61  ;;  %565 = vmatpush.bf16.msrb.mxu1 %v543_v60 }
  0xbe   : > { %1191 = vmatmul.msk.bf16.vlgmr.msra.gmra.mxu0 %vm261_vm1, %v1190_v62  ;;  %1192 = vmatmul.msk.bf16.vlgmr.msra.gmra.mxu1 %vm261_vm1, %v1190_v62 }
  0xc0   : > { %v576_v2 = vpop.permute.xlu0 %575 }
  0xc1   : > { %v578_v3 = vpop.permute.xlu1 %577 }
  0xc2   : > { %v583_v4 = vsel %vm581_vm8, %v578_v3, %v580_v0  ;;  %v582_v5 = vsel %vm581_vm8, %v576_v2, %v578_v3 }
  0xc3   : > { %v591_v6 = vsel %vm265_vm0, %v583_v4, 0  ;;  %v588_v7 = vsel %vm265_vm0, %v582_v5, 0 }
  0xc4   : > { %600 = vmatpush.bf16.msrb.mxu2 %v588_v7  ;;  %613 = vmatpush.bf16.msrb.mxu3 %v591_v6 }
  0xc7   : > { %1200 = vmatmul.msk.bf16.vlgmr.msrb.gmra.mxu2 %vm261_vm1, %v1199_v8  ;;  %1201 = vmatmul.msk.bf16.vlgmr.msrb.gmra.mxu3 %vm261_vm1, %v1199_v8 }
  0xc8   : > { %v624_v10 = vpop.permute.xlu0 %623 }
  0xc9   : > { %v626_v11 = vpop.permute.xlu1 %625 }
  0xca   : > { %v631_v12 = vsel %vm629_vm9, %v626_v11, %v628_v9  ;;  %v630_v13 = vsel %vm629_vm9, %v624_v10, %v626_v11 }
  0xcb   : > { %v639_v15 = vsel %vm265_vm0, %v631_v12, 0  ;;  %v636_v16 = vsel %vm265_vm0, %v630_v13, 0 }
  0xcc   : > { %648 = vmatpush.bf16.msra.mxu0 %v636_v16  ;;  %661 = vmatpush.bf16.msra.mxu1 %v639_v15  ;;  %v683_v16 = vld [vmem:[#allocation2 + $0x8] sm:$0xf] }
  0xce   : > { %1197 = vmatmul.msk.bf16.vlgmr.msrb.gmra.mxu0 %vm261_vm1, %v1196_v14  ;;  %1198 = vmatmul.msk.bf16.vlgmr.msrb.gmra.mxu1 %vm261_vm1, %v1196_v14 }
  0xd0   : > { %v673_v0 = vpop.permute.xlu0 %672 }
  0xde   : > { %1203 = vmatmul.msk.bf16.vlgmr.msra.gmra.mxu0 %vm261_vm1, %v1202_v17  ;;  %1204 = vmatmul.msk.bf16.vlgmr.msra.gmra.mxu1 %vm261_vm1, %v1202_v17 }
 0x11b   : > { %v281_v22 = vpop.f32.mrf.mxu0  ;;  %v294_v23 = vpop.f32.mrf.mxu1 }
 0x11c   : > { %v317_v42 = vadd.f32 %v316_v18, %v281_v22  ;;  %v330_v43 = vadd.f32 %v329_v19, %v294_v23  ;;  %v691_v19 = vunpack.c.l.b16 %v683_v16  ;;  %v684_v22 = vld [vmem:[%s1537_s3] sm:$0xf] }
 0x11e   : > { %v694_v20 = vpack.c.b16 %v691_v19, %v691_v19 }
 0x123   : > { %v283_v24 = vpop.f32.mrf.mxu0  ;;  %v296_v25 = vpop.f32.mrf.mxu1 }
 0x12a   : > { %v410_v26 = vpop.f32.mrf.mxu2  ;;  %v423_v27 = vpop.f32.mrf.mxu3 }
 0x12b   : > { %v362_v28 = vpop.f32.mrf.mxu0  ;;  %v375_v29 = vpop.f32.mrf.mxu1 }
 0x12c   : > { %v379_v44 = vadd.f32 %v362_v28, %v317_v42  ;;  %v380_v45 = vadd.f32 %v375_v29, %v330_v43 }
 0x12e   : > { %v427_v50 = vadd.f32 %v410_v26, %v379_v44  ;;  %v428_v51 = vadd.f32 %v423_v27, %v380_v45 }
 0x132   : > { %v412_v30 = vpop.f32.mrf.mxu2  ;;  %v425_v31 = vpop.f32.mrf.mxu3 }
 0x133   : > { %v364_v32 = vpop.f32.mrf.mxu0  ;;  %v377_v33 = vpop.f32.mrf.mxu1  ;;  %v1205_v31 = vld [vmem:[%s1537_s3 + $0x4] sm:$0xf] }
 0x13a   : > { %v506_v34 = vpop.f32.mrf.mxu2  ;;  %v519_v35 = vpop.f32.mrf.mxu3 }
 0x13b   : > { %v458_v36 = vpop.f32.mrf.mxu0  ;;  %v471_v37 = vpop.f32.mrf.mxu1 }
 0x13c   : > { %v475_v52 = vadd.f32 %v458_v36, %v427_v50  ;;  %v476_v53 = vadd.f32 %v471_v37, %v428_v51 }
 0x13e   : > { %v523_v58 = vadd.f32 %v506_v34, %v475_v52  ;;  %v524_v59 = vadd.f32 %v519_v35, %v476_v53 }
 0x142   : > { %v508_v38 = vpop.f32.mrf.mxu2  ;;  %v521_v39 = vpop.f32.mrf.mxu3 }
 0x143   : > { %v460_v40 = vpop.f32.mrf.mxu0  ;;  %v473_v41 = vpop.f32.mrf.mxu1 }
 0x14a   : > { %v602_v46 = vpop.f32.mrf.mxu2  ;;  %v615_v47 = vpop.f32.mrf.mxu3 }
 0x14b   : > { %v554_v48 = vpop.f32.mrf.mxu0  ;;  %v567_v49 = vpop.f32.mrf.mxu1 }
 0x14c   : > { %v571_v60 = vadd.f32 %v554_v48, %v523_v58  ;;  %v572_v61 = vadd.f32 %v567_v49, %v524_v59 }
 0x14e   : > { %v619_v62 = vadd.f32 %v602_v46, %v571_v60  ;;  %v620_v63 = vadd.f32 %v615_v47, %v572_v61  ;;  %v1213_v46 = vld [vmem:[%s1537_s3 + $0xc] sm:$0xf]  ;;  %v1210_v47 = vld [vmem:[%s1537_s3 + $0x8] sm:$0xf]  ;;  %v1219_v61 = vld [vmem:[%s1537_s3 + $0x14] sm:$0xf] }
 0x152   : > { %v604_v54 = vpop.f32.mrf.mxu2  ;;  %v617_v55 = vpop.f32.mrf.mxu3 }
 0x153   : > { %v556_v56 = vpop.f32.mrf.mxu0  ;;  %v569_v57 = vpop.f32.mrf.mxu1 }
 0x15b   : > { %v650_v1 = vpop.f32.mrf.mxu0  ;;  %v663_v2 = vpop.f32.mrf.mxu1 }
 0x15c   : > { %v667_v3 = vadd.f32 %v650_v1, %v619_v62  ;;  %v668_v4 = vadd.f32 %v663_v2, %v620_v63  ;;  %v1216_v62 = vld [vmem:[%s1537_s3 + $0x10] sm:$0xf] }
 0x15e   : > { %v675_v5 = vadd.f32 %v673_v0, %v667_v3  ;;  %v676_v6 = vadd.f32 %v673_v0, %v668_v4 }
 0x160   : > { %v677_v7 = vmax.f32 %v675_v5, 0.0  ;;  %v678_v8 = vmax.f32 %v676_v6, 0.0  ;;  %v1104_v6 = vld [vmem:[%s1538_s4] sm:$0xff] }
 0x162   : > { %v679_v9 = vpack.c.bf16 %v678_v8, %v677_v7 }
 0x163   : > { %v652_v10 = vpop.f32.mrf.mxu0  ;;  %v665_v11 = vpop.f32.mrf.mxu1 }
 0x164   : > { %v689_v12 = vunpack.c.l.b16 %v679_v9  ;;  %v690_v13 = vunpack.c.h.b16 %v679_v9 }
 0x166   : > { %v692_v14 = vpack.c.b16 %v689_v12, %v689_v12  ;;  %v693_v15 = vpack.c.b16 %v690_v13, %v690_v13 }
 0x168   : > { %779 = vrot.lane.b32.xlu0 %v693_v15, %s1263_s25  ;;  %697 = vrot.lane.b32.xlu2 %v693_v15, %s1262_s24  ;;  %v744_v17 = vsel %vm707_vm10, %v692_v14, 0  ;;  %v747_v18 = vsel %vm707_vm10, %v693_v15, 0 }
 0x169   : > { %695 = vrot.lane.b32.xlu1 %v692_v14, %s1262_s24  ;;  %756 = vmatpush.bf16.msrb.mxu0 %v744_v17 }
 0x16a   : > { %769 = vmatpush.bf16.msrb.mxu1 %v747_v18 }
 0x16c   : > { %1208 = vmatmul.msk.bf16.vlgmr.msrb.gmra.mxu0 %vm703_vm11, %v684_v22 }
 0x16d   : > { %1209 = vmatmul.msk.bf16.vlgmr.msrb.gmra.mxu1 %vm703_vm11, %v684_v22  ;;  %v1228_v22 = vld [vmem:[%s1537_s3 + $0x20] sm:$0xf] }
 0x170   : > { %873 = vrot.lane.b32.xlu0 %v693_v15, %s1265_s27  ;;  %777 = vrot.lane.b32.xlu2 %v692_v14, %s1263_s25 }
 0x171   : > { %699 = vrot.lane.b32.xlu1 %v694_v20, %s1262_s24  ;;  %s224_s24 = scalar_lea.vmem %s1539_s5, %s1233_s9 }
 0x178   : > { %826 = vrot.lane.b32.xlu0 %v693_v15, %s1264_s26  ;;  %871 = vrot.lane.b32.xlu2 %v692_v14, %s1265_s27 }
 0x179   : > { %781 = vrot.lane.b32.xlu1 %v694_v20, %s1263_s25 }
 0x180   : > { %967 = vrot.lane.b32.xlu0 %v693_v15, %s1267_s29  ;;  %824 = vrot.lane.b32.xlu2 %v692_v14, %s1264_s26 }
 0x181   : > { %875 = vrot.lane.b32.xlu1 %v694_v20, %s1265_s27 }
 0x188   : > { %920 = vrot.lane.b32.xlu0 %v693_v15, %s1266_s28  ;;  %965 = vrot.lane.b32.xlu2 %v692_v14, %s1267_s29 }
 0x189   : > { %828 = vrot.lane.b32.xlu1 %v694_v20, %s1264_s26 }
 0x190   : > { %1061 = vrot.lane.b32.xlu0 %v693_v15, %s1269_s6  ;;  %918 = vrot.lane.b32.xlu2 %v692_v14, %s1266_s28 }
 0x191   : > { %969 = vrot.lane.b32.xlu1 %v694_v20, %s1267_s29 }
 0x198   : > { %1014 = vrot.lane.b32.xlu0 %v693_v15, %s1268_s30  ;;  %1059 = vrot.lane.b32.xlu2 %v692_v14, %s1269_s6  ;;  %v1222_v15 = vld [vmem:[%s1537_s3 + $0x18] sm:$0xf] }
 0x199   : > { %922 = vrot.lane.b32.xlu1 %v694_v20, %s1266_s28 }
 0x1a0   : > { %1012 = vrot.lane.b32.xlu2 %v692_v14, %s1268_s30  ;;  %v1225_v14 = vld [vmem:[%s1537_s3 + $0x1c] sm:$0xf] }
 0x1a1   : > { %1063 = vrot.lane.b32.xlu1 %v694_v20, %s1269_s6 }
 0x1a8   : > { %1107 = vperm.xlu2 %1253, %v1104_v6  }
 0x1a9   : > { %1016 = vrot.lane.b32.xlu1 %v694_v20, %s1268_s30 }
 0x1c2   : > { %v698_v21 = vpop.permute.xlu2 %697 }
 0x1ca   : > { %v778_v23 = vpop.permute.xlu2 %777 }
 0x1d2   : > { %v872_v24 = vpop.permute.xlu2 %871 }
 0x1da   : > { %v780_v25 = vpop.permute.xlu0 %779  ;;  %v825_v32 = vpop.permute.xlu2 %824 }
 0x1db   : > { %v783_v26 = vsel %vm341_vm2, %v778_v23, %v780_v25  ;;  %v696_v27 = vpop.permute.xlu1 %695 }
 0x1dc   : > { %v789_v28 = vsel %vm707_vm10, %v783_v26, 0  ;;  %v701_v29 = vsel %vm258_vm3, %v696_v27, %v698_v21 }
 0x1dd   : > { %v709_v30 = vsel %vm707_vm10, %v701_v29, 0 }
 0x1de   : > { %721 = vmatpush.bf16.msra.mxu2 %v709_v30 }
 0x1e1   : > { %1206 = vmatmul.msk.bf16.vlgmr.msra.gmra.mxu2 %vm703_vm11, %v1205_v31 }
 0x1e2   : > { %801 = vmatpush.bf16.msrb.mxu2 %v789_v28  ;;  %v874_v33 = vpop.permute.xlu0 %873  ;;  %v966_v42 = vpop.permute.xlu2 %965 }
 0x1e3   : > { %v877_v34 = vsel %vm437_vm5, %v872_v24, %v874_v33  ;;  %v700_v35 = vpop.permute.xlu1 %699 }
 0x1e4   : > { %v883_v36 = vsel %vm707_vm10, %v877_v34, 0  ;;  %v702_v37 = vsel %vm258_vm3, %v698_v21, %v700_v35 }
 0x1e5   : > { %v712_v38 = vsel %vm707_vm10, %v702_v37, 0 }
 0x1e6   : > { %895 = vmatpush.bf16.msra.mxu2 %v883_v36  ;;  %734 = vmatpush.bf16.msra.mxu3 %v712_v38 }
 0x1e9   : > { %1207 = vmatmul.msk.bf16.vlgmr.msra.gmra.mxu3 %vm703_vm11, %v1205_v31  ;;  %v758_v23 = vpop.f32.mrf.mxu0 }
 0x1ea   : > { %v827_v39 = vpop.permute.xlu0 %826  ;;  %v919_v54 = vpop.permute.xlu2 %918 }
 0x1eb   : > { %v830_v40 = vsel %vm389_vm4, %v825_v32, %v827_v39  ;;  %v782_v41 = vpop.permute.xlu1 %781  ;;  %v771_v24 = vpop.f32.mrf.mxu1 }
 0x1ec   : > { %v836_v43 = vsel %vm707_vm10, %v830_v40, 0  ;;  %v784_v44 = vsel %vm341_vm2, %v780_v25, %v782_v41 }
 0x1ed   : > { %v792_v45 = vsel %vm707_vm10, %v784_v44, 0  ;;  %848 = vmatpush.bf16.msra.mxu0 %v836_v43 }
 0x1ee   : > { %814 = vmatpush.bf16.msrb.mxu3 %v792_v45 }
 0x1f0   : > { %1214 = vmatmul.msk.bf16.vlgmr.msra.gmra.mxu0 %vm703_vm11, %v1213_v46 }
 0x1f1   : > { %1211 = vmatmul.msk.bf16.vlgmr.msrb.gmra.mxu2 %vm703_vm11, %v1210_v47  ;;  %v760_v25 = vpop.f32.mrf.mxu0 }
 0x1f2   : > { %v968_v48 = vpop.permute.xlu0 %967  ;;  %v1060_v63 = vpop.permute.xlu2 %1059 }
 0x1f3   : > { %v971_v49 = vsel %vm533_vm7, %v966_v42, %v968_v48  ;;  %v876_v50 = vpop.permute.xlu1 %875  ;;  %v773_v26 = vpop.f32.mrf.mxu1 }
 0x1f4   : > { %v977_v51 = vsel %vm707_vm10, %v971_v49, 0  ;;  %v878_v52 = vsel %vm437_vm5, %v874_v33, %v876_v50 }
 0x1f5   : > { %v886_v53 = vsel %vm707_vm10, %v878_v52, 0  ;;  %989 = vmatpush.bf16.msrb.mxu2 %v977_v51 }
 0x1f6   : > { %908 = vmatpush.bf16.msra.mxu3 %v886_v53 }
 0x1f9   : > { %1212 = vmatmul.msk.bf16.vlgmr.msrb.gmra.mxu3 %vm703_vm11, %v1210_v47 }
 0x1fa   : > { %v921_v55 = vpop.permute.xlu0 %920  ;;  %v1013_v7 = vpop.permute.xlu2 %1012 }
 0x1fb   : > { %v924_v56 = vsel %vm485_vm6, %v919_v54, %v921_v55  ;;  %v829_v57 = vpop.permute.xlu1 %828 }
 0x1fc   : > { %v930_v58 = vsel %vm707_vm10, %v924_v56, 0  ;;  %v831_v59 = vsel %vm389_vm4, %v827_v39, %v829_v57 }
 0x1fd   : > { %v839_v60 = vsel %vm707_vm10, %v831_v59, 0  ;;  %942 = vmatpush.bf16.msrb.mxu0 %v930_v58 }
 0x1fe   : > { %861 = vmatpush.bf16.msra.mxu1 %v839_v60 }
 0x200   : > { %1220 = vmatmul.msk.bf16.vlgmr.msrb.gmra.mxu0 %vm703_vm11, %v1219_v61 }
 0x201   : > { %1215 = vmatmul.msk.bf16.vlgmr.msra.gmra.mxu1 %vm703_vm11, %v1213_v46  ;;  %1217 = vmatmul.msk.bf16.vlgmr.msra.gmra.mxu2 %vm703_vm11, %v1216_v62 }
 0x202   : > { %v1062_v0 = vpop.permute.xlu0 %1061 }
 0x203   : > { %v1065_v1 = vsel %vm629_vm9, %v1060_v63, %v1062_v0  ;;  %v970_v2 = vpop.permute.xlu1 %969 }
 0x204   : > { %v1071_v3 = vsel %vm707_vm10, %v1065_v1, 0  ;;  %v972_v4 = vsel %vm533_vm7, %v968_v48, %v970_v2 }
 0x205   : > { %v980_v5 = vsel %vm707_vm10, %v972_v4, 0  ;;  %1083 = vmatpush.bf16.msra.mxu2 %v1071_v3 }
 0x206   : > { %1002 = vmatpush.bf16.msrb.mxu3 %v980_v5 }
 0x209   : > { %1218 = vmatmul.msk.bf16.vlgmr.msra.gmra.mxu3 %vm703_vm11, %v1216_v62 }
 0x20a   : > { %v1015_v8 = vpop.permute.xlu0 %1014 }
 0x20b   : > { %v1018_v9 = vsel %vm581_vm8, %v1013_v7, %v1015_v8  ;;  %v923_v10 = vpop.permute.xlu1 %922 }
 0x20c   : > { %v1024_v11 = vsel %vm707_vm10, %v1018_v9, 0  ;;  %v925_v12 = vsel %vm485_vm6, %v921_v55, %v923_v10 }
 0x20d   : > { %v933_v13 = vsel %vm707_vm10, %v925_v12, 0  ;;  %1036 = vmatpush.bf16.msra.mxu0 %v1024_v11 }
 0x20e   : > { %955 = vmatpush.bf16.msrb.mxu1 %v933_v13 }
 0x210   : > { %1226 = vmatmul.msk.bf16.vlgmr.msra.gmra.mxu0 %vm703_vm11, %v1225_v14 }
 0x211   : > { %1221 = vmatmul.msk.bf16.vlgmr.msrb.gmra.mxu1 %vm703_vm11, %v1219_v61  ;;  %1223 = vmatmul.msk.bf16.vlgmr.msrb.gmra.mxu2 %vm703_vm11, %v1222_v15 }
 0x213   : > { %v1064_v16 = vpop.permute.xlu1 %1063 }
 0x214   : > { %v1066_v17 = vsel %vm629_vm9, %v1062_v0, %v1064_v16  ;;  %v1108_v0 = vpop.permute.xlu2 %1107 }
 0x215   : > { %v1074_v18 = vsel %vm707_vm10, %v1066_v17, 0 }
 0x216   : > { %1096 = vmatpush.bf16.msra.mxu3 %v1074_v18 }
 0x219   : > { %1224 = vmatmul.msk.bf16.vlgmr.msrb.gmra.mxu3 %vm703_vm11, %v1222_v15 }
 0x21b   : > { %v1017_v19 = vpop.permute.xlu1 %1016 }
 0x21c   : > { %v1019_v20 = vsel %vm581_vm8, %v1015_v8, %v1017_v19 }
 0x21d   : > { %v1027_v21 = vsel %vm707_vm10, %v1019_v20, 0 }
 0x21e   : > { %1049 = vmatpush.bf16.msra.mxu1 %v1027_v21 }
 0x221   : > { %1227 = vmatmul.msk.bf16.vlgmr.msra.gmra.mxu1 %vm703_vm11, %v1225_v14  ;;  %1229 = vmatmul.msk.bf16.vlgmr.msra.gmra.mxu2 %vm703_vm11, %v1228_v22 }
 0x229   : > { %1230 = vmatmul.msk.bf16.vlgmr.msra.gmra.mxu3 %vm703_vm11, %v1228_v22 }
 0x264   : > { %v723_v27 = vpop.f32.mrf.mxu2 }
 0x265   : > { %v759_v46 = vadd.f32 %v758_v23, %v723_v27 }
 0x26c   : > { %v725_v28 = vpop.f32.mrf.mxu2  ;;  %v736_v29 = vpop.f32.mrf.mxu3 }
 0x26d   : > { %v850_v30 = vpop.f32.mrf.mxu0  ;;  %v772_v53 = vadd.f32 %v771_v24, %v736_v29 }
 0x274   : > { %v738_v31 = vpop.f32.mrf.mxu3  ;;  %v803_v32 = vpop.f32.mrf.mxu2 }
 0x275   : > { %v852_v33 = vpop.f32.mrf.mxu0  ;;  %v820_v47 = vadd.f32 %v803_v32, %v759_v46 }
 0x277   : > { %v867_v52 = vadd.f32 %v850_v30, %v820_v47 }
 0x27c   : > { %v805_v34 = vpop.f32.mrf.mxu2  ;;  %v816_v35 = vpop.f32.mrf.mxu3 }
 0x27d   : > { %v944_v36 = vpop.f32.mrf.mxu0  ;;  %v821_v55 = vadd.f32 %v816_v35, %v772_v53 }
 0x27e   : > { %v863_v37 = vpop.f32.mrf.mxu1 }
 0x27f   : > { %v868_v60 = vadd.f32 %v863_v37, %v821_v55 }
 0x284   : > { %v818_v38 = vpop.f32.mrf.mxu3  ;;  %v897_v39 = vpop.f32.mrf.mxu2 }
 0x285   : > { %v946_v40 = vpop.f32.mrf.mxu0  ;;  %v914_v54 = vadd.f32 %v897_v39, %v867_v52 }
 0x286   : > { %v865_v41 = vpop.f32.mrf.mxu1 }
 0x287   : > { %v961_v58 = vadd.f32 %v944_v36, %v914_v54 }
 0x28c   : > { %v899_v42 = vpop.f32.mrf.mxu2  ;;  %v910_v43 = vpop.f32.mrf.mxu3 }
 0x28d   : > { %v1038_v44 = vpop.f32.mrf.mxu0  ;;  %v915_v62 = vadd.f32 %v910_v43, %v868_v60 }
 0x28e   : > { %v957_v45 = vpop.f32.mrf.mxu1 }
 0x28f   : > { %v962_v3 = vadd.f32 %v957_v45, %v915_v62 }
 0x294   : > { %v912_v48 = vpop.f32.mrf.mxu3  ;;  %v991_v49 = vpop.f32.mrf.mxu2 }
 0x295   : > { %v1040_v50 = vpop.f32.mrf.mxu0  ;;  %v1008_v61 = vadd.f32 %v991_v49, %v961_v58 }
 0x296   : > { %v959_v51 = vpop.f32.mrf.mxu1 }
 0x297   : > { %v1055_v63 = vadd.f32 %v1038_v44, %v1008_v61 }
 0x29c   : > { %v993_v56 = vpop.f32.mrf.mxu2  ;;  %v1004_v57 = vpop.f32.mrf.mxu3 }
 0x29d   : > { %v1009_v6 = vadd.f32 %v1004_v57, %v962_v3 }
 0x29e   : > { %v1051_v59 = vpop.f32.mrf.mxu1 }
 0x29f   : > { %v1056_v9 = vadd.f32 %v1051_v59, %v1009_v6 }
 0x2a4   : > { %v1006_v1 = vpop.f32.mrf.mxu3  ;;  %v1085_v2 = vpop.f32.mrf.mxu2 }
 0x2a5   : > { %v1102_v4 = vadd.f32 %v1085_v2, %v1055_v63 }
 0x2a6   : > { %v1053_v5 = vpop.f32.mrf.mxu1 }
 0x2a7   : > { %v1110_v7 = vadd.f32 %v1108_v0, %v1102_v4 }
 0x2a9   : > { %v1112_v8 = vmax.f32 %v1110_v7, 0.0 }
 0x2ab   : > { %1114 = vst [vmem:[%s224_s24] sm:$0xff] %v1112_v8 }
 0x2ac   : > { %v1098_v10 = vpop.f32.mrf.mxu3  ;;  %v1087_v11 = vpop.f32.mrf.mxu2 }
 0x2ad   : > { %v1103_v12 = vadd.f32 %v1098_v10, %v1056_v9 }
 0x2af   : > { %v1111_v13 = vadd.f32 %v1108_v0, %v1103_v12 }
 0x2b1   : > { %v1113_v14 = vmax.f32 %v1111_v13, 0.0 }
 0x2b3   : > { %1115 = vst [vmem:[%s224_s24 + $0x8] sm:$0xff] %v1113_v14 }
 0x2b4   : > { %v1100_v15 = vpop.f32.mrf.mxu3 }
 0x2b5 PF: > { %s15_s18 = sadd.s32 1, %s1260_s18  }
 0x2b6   : > { %p12_p4 = scmp.ge.s32.totalorder %s15_s18, 4  }
 0x2b8   :  { %14 = sbr.rel (!%p12_p4) target bundleno = 1 (0x1), region = 87 }

</bundles_post_ra>
